<compile_context>
chip_gen: v6e
topology: v6e:2x2x1
jax: 0.10.0
libtpu: 0.0.40
codegen_flags: <defaults>
</compile_context>

<pallas_src>
import functools
import math

import jax
import jax.numpy as jnp
from jax.experimental import pallas as pl
from jax.experimental.pallas import tpu as pltpu

_WIDTH = 512          # lane-dense last dim (multiple of 128)
_BLOCK_ROWS = 512     # (512, 512) f32 block = 1 MiB per input per buffer
_LOG_EPS = math.log(1e-10)  # torch.clamp lower bound, in log space


def _focal_kernel(x_ref, t_ref, out_ref, *, gamma, n_valid, block_rows, width):
    x = x_ref[...].astype(jnp.float32)
    t = t_ref[...].astype(jnp.float32)

    # In-kernel validity mask (covers both the zero tail-pad and any garbage
    # in a partial last block).  n_valid is static, so use row/lane compare
    # (no int32 overflow for huge tensors).
    shape = (block_rows, width)
    row = jax.lax.broadcasted_iota(jnp.int32, shape, 0) + pl.program_id(0) * block_rows
    lane = jax.lax.broadcasted_iota(jnp.int32, shape, 1)
    q, r = divmod(n_valid, width)          # python ints
    valid = (row < q) | ((row == q) & (lane < r))

    x = jnp.where(valid, x, 0.0)
    t = jnp.where(valid, t, 0.0)

    # log-sigmoid:  log p = -softplus(-x),  log(1-p) = -x - softplus(-x)
    # (stable softplus; plain exp/log only -> guaranteed Mosaic support)
    sp_neg = jnp.maximum(-x, 0.0) + jnp.log(1.0 + jnp.exp(-jnp.abs(x)))
    log_p = -sp_neg
    log_1mp = -x - sp_neg

    # Emulate torch.clamp(p, 1e-10, 1 - 1e-10) in log space (also kills the
    # latent 0 * (-inf) = NaN of the naive formulation).
    log_eps = jnp.float32(_LOG_EPS)
    log_p = jnp.maximum(log_p, log_eps)
    log_1mp = jnp.maximum(log_1mp, log_eps)

    g = float(gamma)
    if g.is_integer() and 0.0 <= g <= 8.0:
        # Integer gamma: powers via repeated multiply on the VPU (1 EUP exp).
        p = jnp.exp(log_p)
        c0 = p ** int(g)
        c1 = (1.0 - p) ** int(g)
    else:
        # General gamma: two extra EUP exps.
        c0 = jnp.exp(g * log_p)
        c1 = jnp.exp(g * log_1mp)

    loss = -(c1 * t * log_p + c0 * (1.0 - t) * log_1mp)
    loss = jnp.where(valid, loss, 0.0)

    # Vector partial sum: fold sublane groups with pure VPU adds (the reshape
    # only splits the major dim, so it is layout-free); no per-step XLU reduce.
    out_ref[...] = jnp.sum(loss.reshape(block_rows // 8, 8, width), axis=0)


def focal_loss(logits, target, gamma):
    """Mean sigmoid focal loss, matching PyTorch FOCALLoss.forward."""
    assert logits.shape == target.shape
    n = int(logits.size)

    x = logits.reshape(-1)
    t = target.reshape(-1)

    # Pad only the ragged tail (at most 8*_WIDTH-1 elements) so the flat array
    # reshapes to (rows, _WIDTH) with rows a multiple of 8.  For typical
    # shapes (divisible sizes) this branch is skipped entirely.
    pad = (-n) % (8 * _WIDTH)
    if pad:
        x = jnp.pad(x, (0, pad))
        t = jnp.pad(t, (0, pad))
    rows = (n + pad) // _WIDTH
    x = x.reshape(rows, _WIDTH)
    t = t.reshape(rows, _WIDTH)

    block_rows = min(_BLOCK_ROWS, rows)   # rows is a multiple of 8
    n_blocks = pl.cdiv(rows, block_rows)

    kernel = functools.partial(
        _focal_kernel,
        gamma=float(gamma),
        n_valid=n,
        block_rows=block_rows,
        width=_WIDTH,
    )

    in_spec = pl.BlockSpec((block_rows, _WIDTH), lambda i: (i, 0))
    out_spec = pl.BlockSpec((8, _WIDTH), lambda i: (i, 0))

    partials = pl.pallas_call(
        kernel,
        out_shape=jax.ShapeDtypeStruct((n_blocks * 8, _WIDTH), jnp.float32),
        grid_spec=pltpu.PrefetchScalarGridSpec(
            num_scalar_prefetch=0,
            grid=(n_blocks,),
            in_specs=[in_spec, in_spec],
            out_specs=out_spec,
        ),
        compiler_params=pltpu.CompilerParams(
            dimension_semantics=("parallel",),  # independent blocks -> 2 TCs on v7x
        ),
    )(x, t)

    # Tiny final reduction + mean in plain XLA.
    return jnp.sum(partials) / jnp.float32(n)


def focal_loss_ref(logits, target, gamma):
    """Pure-JAX reference mirroring the PyTorch module literally."""
    p = jax.nn.sigmoid(logits.astype(jnp.float32))
    p = jnp.clip(p, 1e-10, 1.0 - 1e-10)
    t = target.astype(jnp.float32)
    c0 = p ** gamma
    c1 = (1.0 - p) ** gamma
    return jnp.mean(-(c1 * t * jnp.log(p) + c0 * (1.0 - t) * jnp.log(1.0 - p)))


if __name__ == "__main__":
    key = jax.random.PRNGKey(0)
    k1, k2, k3, k4 = jax.random.split(key, 4)

    # Small NCHW-shaped example consistent with a segmentation logit map.
    gamma = 2.0
    x = jax.random.normal(k1, (2, 4, 16, 16), dtype=jnp.float32)
    tgt = jax.random.bernoulli(k2, 0.3, (2, 4, 16, 16)).astype(jnp.float32)

    out = jax.block_until_ready(focal_loss(x, tgt, gamma))
    ref = focal_loss_ref(x, tgt, gamma)
    assert jnp.allclose(out, ref, rtol=1e-4, atol=1e-6), (out, ref)

    # Ragged size + non-integer gamma exercises the in-kernel mask and the
    # general exp(gamma * log) path.
    gamma2 = 1.5
    x2 = jax.random.normal(k3, (2, 3, 7, 11), dtype=jnp.float32)
    tgt2 = jax.random.bernoulli(k4, 0.5, (2, 3, 7, 11)).astype(jnp.float32)

    out2 = jax.block_until_ready(focal_loss(x2, tgt2, gamma2))
    ref2 = focal_loss_ref(x2, tgt2, gamma2)
    assert jnp.allclose(out2, ref2, rtol=1e-4, atol=1e-6), (out2, ref2)

    print("KERNEL_OK")
</pallas_src>

<mosaic_0001>
module attributes {stable_mosaic.version = 11 : i64} {
  func.func @_focal_kernel(%arg0: i32, %arg1: memref<8x512xf32, #tpu.memory_space<vmem>>, %arg2: memref<8x512xf32, #tpu.memory_space<vmem>>, %arg3: memref<8x512xf32, #tpu.memory_space<vmem>>) attributes {dimension_semantics = [#tpu.dimension_semantics<parallel>], iteration_bounds = array<i64: 1>, scalar_prefetch = 0 : i64, scratch_operands = 0 : i64, tpu.core_type = #tpu.core_type<tc>, window_params = [{transform_indices = @transform_0, window_bounds = array<i64: 8, 512>}, {transform_indices = @transform_1, window_bounds = array<i64: 8, 512>}, {transform_indices = @transform_2, window_bounds = array<i64: 8, 512>}]} {
    %c0 = arith.constant 0 : index
    %c0_0 = arith.constant 0 : index
    %0 = vector.load %arg1[%c0, %c0_0] : memref<8x512xf32, #tpu.memory_space<vmem>>, vector<8x512xf32>
    %c0_1 = arith.constant 0 : index
    %c0_2 = arith.constant 0 : index
    %1 = vector.load %arg2[%c0_1, %c0_2] : memref<8x512xf32, #tpu.memory_space<vmem>>, vector<8x512xf32>
    %2 = tpu.iota {dimensions = array<i32: 0>} : vector<8x512xi32>
    %c8_i32 = arith.constant 8 : i32
    %3 = arith.muli %arg0, %c8_i32 : i32
    %4 = vector.broadcast %3 : i32 to vector<8x512xi32>
    %5 = arith.addi %2, %4 : vector<8x512xi32>
    %6 = tpu.iota {dimensions = array<i32: 1>} : vector<8x512xi32>
    %c4_i32 = arith.constant 4 : i32
    %7 = vector.broadcast %c4_i32 : i32 to vector<8x512xi32>
    %8 = arith.cmpi slt, %5, %7 : vector<8x512xi32>
    %c4_i32_3 = arith.constant 4 : i32
    %9 = vector.broadcast %c4_i32_3 : i32 to vector<8x512xi32>
    %10 = arith.cmpi eq, %5, %9 : vector<8x512xi32>
    %c0_i32 = arith.constant 0 : i32
    %11 = vector.broadcast %c0_i32 : i32 to vector<8x512xi32>
    %12 = arith.cmpi slt, %6, %11 : vector<8x512xi32>
    %13 = arith.andi %10, %12 : vector<8x512xi1>
    %14 = arith.ori %8, %13 : vector<8x512xi1>
    %cst = arith.constant 0.000000e+00 : f32
    %15 = vector.broadcast %cst : f32 to vector<8x512xf32>
    %16 = arith.select %14, %0, %15 : vector<8x512xi1>, vector<8x512xf32>
    %cst_4 = arith.constant 0.000000e+00 : f32
    %17 = vector.broadcast %cst_4 : f32 to vector<8x512xf32>
    %18 = arith.select %14, %1, %17 : vector<8x512xi1>, vector<8x512xf32>
    %cst_5 = arith.constant 0.000000e+00 : f32
    %19 = vector.broadcast %cst_5 : f32 to vector<8x512xf32>
    %20 = arith.subf %19, %16 : vector<8x512xf32>
    %cst_6 = arith.constant 0.000000e+00 : f32
    %21 = vector.broadcast %cst_6 : f32 to vector<8x512xf32>
    %22 = arith.maximumf %20, %21 : vector<8x512xf32>
    %23 = math.absf %16 : vector<8x512xf32>
    %cst_7 = arith.constant 0.000000e+00 : f32
    %24 = vector.broadcast %cst_7 : f32 to vector<8x512xf32>
    %25 = arith.subf %24, %23 : vector<8x512xf32>
    %26 = math.exp %25 : vector<8x512xf32>
    %cst_8 = arith.constant 1.000000e+00 : f32
    %27 = vector.broadcast %cst_8 : f32 to vector<8x512xf32>
    %28 = arith.addf %27, %26 : vector<8x512xf32>
    %29 = math.log %28 : vector<8x512xf32>
    %30 = arith.addf %22, %29 : vector<8x512xf32>
    %cst_9 = arith.constant 0.000000e+00 : f32
    %31 = vector.broadcast %cst_9 : f32 to vector<8x512xf32>
    %32 = arith.subf %31, %30 : vector<8x512xf32>
    %cst_10 = arith.constant 0.000000e+00 : f32
    %33 = vector.broadcast %cst_10 : f32 to vector<8x512xf32>
    %34 = arith.subf %33, %16 : vector<8x512xf32>
    %35 = arith.subf %34, %30 : vector<8x512xf32>
    %cst_11 = arith.constant -23.0258503 : f32
    %36 = vector.broadcast %cst_11 : f32 to vector<8x512xf32>
    %37 = arith.maximumf %32, %36 : vector<8x512xf32>
    %cst_12 = arith.constant -23.0258503 : f32
    %38 = vector.broadcast %cst_12 : f32 to vector<8x512xf32>
    %39 = arith.maximumf %35, %38 : vector<8x512xf32>
    %40 = math.exp %37 : vector<8x512xf32>
    %41 = arith.mulf %40, %40 : vector<8x512xf32>
    %cst_13 = arith.constant 1.000000e+00 : f32
    %42 = vector.broadcast %cst_13 : f32 to vector<8x512xf32>
    %43 = arith.subf %42, %40 : vector<8x512xf32>
    %44 = arith.mulf %43, %43 : vector<8x512xf32>
    %45 = arith.mulf %44, %18 : vector<8x512xf32>
    %46 = arith.mulf %45, %37 : vector<8x512xf32>
    %cst_14 = arith.constant 1.000000e+00 : f32
    %47 = vector.broadcast %cst_14 : f32 to vector<8x512xf32>
    %48 = arith.subf %47, %18 : vector<8x512xf32>
    %49 = arith.mulf %41, %48 : vector<8x512xf32>
    %50 = arith.mulf %49, %39 : vector<8x512xf32>
    %51 = arith.addf %46, %50 : vector<8x512xf32>
    %cst_15 = arith.constant 0.000000e+00 : f32
    %52 = vector.broadcast %cst_15 : f32 to vector<8x512xf32>
    %53 = arith.subf %52, %51 : vector<8x512xf32>
    %cst_16 = arith.constant 0.000000e+00 : f32
    %54 = vector.broadcast %cst_16 : f32 to vector<8x512xf32>
    %55 = arith.select %14, %53, %54 : vector<8x512xi1>, vector<8x512xf32>
    %56 = vector.shape_cast %55 : vector<8x512xf32> to vector<1x8x512xf32>
    %cst_17 = arith.constant dense<0.000000e+00> : vector<8x512xf32>
    %57 = vector.multi_reduction <add>, %56, %cst_17 [0] : vector<1x8x512xf32> to vector<8x512xf32>
    %c0_18 = arith.constant 0 : index
    %c0_19 = arith.constant 0 : index
    %58 = vector.load %arg3[%c0_18, %c0_19] : memref<8x512xf32, #tpu.memory_space<vmem>>, vector<8x512xf32>
    tpu.vector_store %arg3[%c0_18, %c0_19], %57 {strides = array<i32>} : memref<8x512xf32, #tpu.memory_space<vmem>>, vector<8x512xf32>,
    return
  }
  func.func @transform_0(%arg0: i32) -> (i32, i32) {
    %c0_i32 = arith.constant 0 : i32
    %c0_i32_0 = arith.constant 0 : i32
    return %arg0, %c0_i32 : i32, i32
  }
  func.func @transform_1(%arg0: i32) -> (i32, i32) {
    %c0_i32 = arith.constant 0 : i32
    %c0_i32_0 = arith.constant 0 : i32
    return %arg0, %c0_i32 : i32, i32
  }
  func.func @transform_2(%arg0: i32) -> (i32, i32) {
    %c0_i32 = arith.constant 0 : i32
    %c0_i32_0 = arith.constant 0 : i32
    return %arg0, %c0_i32 : i32, i32
  }
}

</mosaic_0001>

<bundles_post_ra>
// kernel: tpu_custom_call.1
= control target key start
LH: loop header
LB: loop body
LE: loop exit
PB: predicated region body
PF: predicated region fallthrough
CT: control target
= control target key end

     0   :  { %7 = vsyncpa [#allocation3], 0  ;;  %s371_s0 = inlined_call_operand.hbm [shape: f32[8,512], index: 0, kind: input, shape index: {}]   ;;  %s372_s1 = inlined_call_operand.hbm [shape: f32[8,512], index: 1, kind: input, shape index: {}]   ;;  %s373_s2 = inlined_call_operand.hbm [shape: f32[8,512], index: 2, kind: output, shape index: {}]  }
   0x1   :  { %8 = vsyncpa [#allocation6], 0 }
   0x2   :  { %9 = vsyncpa [#allocation4], 0  ;;  %s301_s9 = smov [#allocation2]   ;;  %s302_s11 = smov [#allocation5]  }
   0x3   :  { %s16_s10 = sshll.u32 %s301_s9, 4  ;;  %s26_s12 = sshll.u32 %s302_s11, 4  ;;  %s17_s10 = int_to_ptr.vmem [resolvable:$true] %s16_s10  ;;  %s27_s12 = int_to_ptr.vmem [resolvable:$true] %s26_s12 }
   0x4   :  { %s243_s13 = scalar_lea.vmem %s17_s10, 512  ;;  %p248_p1 = scmp.lt.s32.totalorder %s17_s10, %s17_s10 }
   0x5   :  { %p244_p0 = scmp.ne.s32.totalorder %s17_s10, %s243_s13  ;;  %p249_p2 = scmp.lt.s32.totalorder %s243_s13, %s243_s13 }
   0x7   :  { %p250_p3 = por %p249_p2, %p248_p1 }
   0x9   :  { %p251_p4 = pnand %p250_p3, %p244_p0 }
   0xb   :  { %254 = shalt.err (!%p251_p4)
}
   0xc   :  { %19 = dma.hbm_to_vmem [thread:$0]  %s371_s0, 512, %s17_s10, [#allocation3]  }
   0xd   :  { %s263_s16 = scalar_lea.vmem %s27_s12, 512  ;;  %p268_p6 = scmp.lt.s32.totalorder %s27_s12, %s27_s12 }
   0xe   :  { %p264_p5 = scmp.ne.s32.totalorder %s27_s12, %s263_s16  ;;  %p269_p7 = scmp.lt.s32.totalorder %s263_s16, %s263_s16 }
  0x10   :  { %p270_p8 = por %p269_p7, %p268_p6 }
  0x12   :  { %p271_p9 = pnand %p270_p8, %p264_p5 }
  0x14   :  { %274 = shalt.err (!%p271_p9)
}
  0x15   :  { %29 = dma.hbm_to_vmem [thread:$0]  %s372_s1, 512, %s27_s12, [#allocation6]  }
  0x16   :  { %295 = dma.done.wait [#allocation3], 512  }
  0x17   :  { %296 = vsyncadd [#allocation3], 4294966784 }
  0x18   :  { %297 = dma.done.wait [#allocation6], 512  }
  0x19   :  { %298 = vsyncadd [#allocation6], 4294966784  ;;  %v44_v0 = vlaneseq  ;;  %v36_v2 = vld [vmem:[#allocation2] sm:$0xff]  ;;  %v37_v3 = vld [vmem:[#allocation2 + $0x8] sm:$0xff]  ;;  %s303_s0 = smov [#allocation7]  }
  0x1a   :  { %v38_v6 = vld [vmem:[#allocation2 + $0x10] sm:$0xff]  ;;  %v39_v10 = vld [vmem:[#allocation2 + $0x18] sm:$0xff]  ;;  %v40_v62 = vld [vmem:[#allocation5] sm:$0xff]  ;;  %s198_s1 = sshll.u32 %s303_s0, 4  ;;  %s199_s1 = int_to_ptr.vmem [resolvable:$true] %s198_s1 }
  0x1b   :  { %v325_v1 = vshrl.u32 %v44_v0, 7  ;;  %v41_v63 = vld [vmem:[#allocation5 + $0x8] sm:$0xff]  ;;  %v42_v0 = vld [vmem:[#allocation5 + $0x10] sm:$0xff]  ;;  %s275_s19 = scalar_lea.vmem %s199_s1, 512  ;;  %p280_p11 = scmp.lt.s32.totalorder %s199_s1, %s199_s1 }
  0x1c   :  { %p276_p10 = scmp.ne.s32.totalorder %s199_s1, %s275_s19  ;;  %p281_p12 = scmp.lt.s32.totalorder %s275_s19, %s275_s19 }
  0x1d   :  { %vm54_vm0 = vcmp.lt.s32.totalorder %v325_v1, 4 }
  0x1e   :  { %v330_v4 = vsel %vm54_vm0, %v36_v2, 0.0  ;;  %v334_v5 = vsel %vm54_vm0, %v37_v3, 0.0  ;;  %v340_v9 = vsel %vm54_vm0, %v38_v6, 0.0  ;;  %v345_v15 = vsel %vm54_vm0, %v39_v10, 0.0  ;;  %p282_p13 = por %p281_p12, %p280_p11 }
  0x1f   :  { %v84_v7 = vand.u32 2147483647, %v330_v4  ;;  %v85_v8 = vand.u32 2147483647, %v334_v5  ;;  %v86_v13 = vand.u32 2147483647, %v340_v9 }
  0x20   :  { %v87_v18 = vand.u32 2147483647, %v345_v15  ;;  %v76_v30 = vsub.f32 0.0, %v330_v4  ;;  %v77_v31 = vsub.f32 0.0, %v334_v5  ;;  %v78_v32 = vsub.f32 0.0, %v340_v9  ;;  %v43_v9 = vld [vmem:[#allocation5 + $0x18] sm:$0xff]  ;;  %p283_p0 = pnand %p282_p13, %p276_p10 }
  0x21   :  { %v88_v11 = vsub.f32 0.0, %v84_v7  ;;  %v89_v12 = vsub.f32 0.0, %v85_v8  ;;  %v90_v17 = vsub.f32 0.0, %v86_v13  ;;  %v79_v38 = vsub.f32 0.0, %v345_v15 }
  0x22   :  { %v91_v20 = vsub.f32 0.0, %v87_v18  ;;  %v80_v33 = vmax.f32 %v76_v30, 0.0  ;;  %v81_v35 = vmax.f32 %v77_v31, 0.0  ;;  %v82_v40 = vmax.f32 %v78_v32, 0.0 }
  0x23   :  { %v92_v14 = vmul.f32 1.442695, %v88_v11  ;;  %v94_v16 = vmul.f32 1.442695, %v89_v12  ;;  %v96_v19 = vmul.f32 1.442695, %v90_v17 }
  0x24   :  { %v98_v21 = vmul.f32 1.442695, %v91_v20  ;;  %v83_v47 = vmax.f32 %v79_v38, 0.0  ;;  %v72_v2 = vsel %vm54_vm0, %v40_v62, 0.0  ;;  %v73_v4 = vsel %vm54_vm0, %v41_v63, 0.0 }
  0x25   :  { %211 = vpow2.f32 %v92_v14  ;;  %v74_v6 = vsel %vm54_vm0, %v42_v0, 0.0  ;;  %v160_v7 = vsub.f32 1.0, %v72_v2  ;;  %v161_v11 = vsub.f32 1.0, %v73_v4 }
  0x26   :  { %213 = vpow2.f32 %v94_v16  ;;  %v162_v16 = vsub.f32 1.0, %v74_v6  ;;  %v75_v20 = vsel %vm54_vm0, %v43_v9, 0.0 }
  0x27   :  { %215 = vpow2.f32 %v96_v19 }
  0x28   :  { %217 = vpow2.f32 %v98_v21 }
  0x32   :  { %v212_v22 = vpop.eup %211 }
  0x33   :  { %v214_v23 = vpop.eup %213  ;;  %v100_v24 = vadd.f32 1.0, %v212_v22 }
  0x34   :  { %v101_v25 = vadd.f32 1.0, %v214_v23  ;;  %v216_v26 = vpop.eup %215 }
  0x35   :  { %219 = vlog2.f32 %v100_v24  ;;  %v102_v27 = vadd.f32 1.0, %v216_v26  ;;  %v218_v28 = vpop.eup %217 }
  0x36   :  { %221 = vlog2.f32 %v101_v25  ;;  %v103_v29 = vadd.f32 1.0, %v218_v28 }
  0x37   :  { %223 = vlog2.f32 %v102_v27 }
  0x38   :  { %225 = vlog2.f32 %v103_v29 }
  0x42   :  { %v220_v34 = vpop.eup %219 }
  0x43   :  { %v222_v36 = vpop.eup %221  ;;  %v105_v37 = vmul.f32 0.6931472, %v220_v34 }
  0x44   :  { %v107_v39 = vmul.f32 0.6931472, %v222_v36  ;;  %v224_v41 = vpop.eup %223 }
  0x45   :  { %v112_v42 = vadd.f32 %v105_v37, %v80_v33  ;;  %v109_v44 = vmul.f32 0.6931472, %v224_v41  ;;  %v226_v45 = vpop.eup %225 }
  0x46   :  { %v113_v43 = vadd.f32 %v107_v39, %v81_v35  ;;  %v111_v50 = vmul.f32 0.6931472, %v226_v45 }
  0x47   :  { %v116_v46 = vsub.f32 0.0, %v112_v42  ;;  %v114_v49 = vadd.f32 %v109_v44, %v82_v40  ;;  %v120_v3 = vsub.f32 %v76_v30, %v112_v42 }
  0x48   :  { %v117_v48 = vsub.f32 0.0, %v113_v43  ;;  %v115_v55 = vadd.f32 %v111_v50, %v83_v47  ;;  %v121_v5 = vsub.f32 %v77_v31, %v113_v43 }
  0x49   :  { %v124_v51 = vmax.f32 %v116_v46, -23.02585  ;;  %v118_v53 = vsub.f32 0.0, %v114_v49  ;;  %v122_v8 = vsub.f32 %v78_v32, %v114_v49  ;;  %v128_v13 = vmax.f32 %v120_v3, -23.02585 }
  0x4a   :  { %v125_v52 = vmax.f32 %v117_v48, -23.02585  ;;  %v119_v58 = vsub.f32 0.0, %v115_v55  ;;  %v129_v17 = vmax.f32 %v121_v5, -23.02585  ;;  %v123_v25 = vsub.f32 %v79_v38, %v115_v55 }
  0x4b   :  { %v132_v54 = vmul.f32 1.442695, %v124_v51  ;;  %v126_v57 = vmax.f32 %v118_v53, -23.02585  ;;  %v130_v24 = vmax.f32 %v122_v8, -23.02585 }
  0x4c   :  { %v134_v56 = vmul.f32 1.442695, %v125_v52  ;;  %v127_v60 = vmax.f32 %v119_v58, -23.02585  ;;  %v163_v32 = vsub.f32 1.0, %v75_v20 }
  0x4d   :  { %227 = vpow2.f32 %v132_v54  ;;  %v136_v59 = vmul.f32 1.442695, %v126_v57  ;;  %v131_v40 = vmax.f32 %v123_v25, -23.02585 }
  0x4e   :  { %229 = vpow2.f32 %v134_v56  ;;  %v138_v61 = vmul.f32 1.442695, %v127_v60 }
  0x4f   :  { %231 = vpow2.f32 %v136_v59 }
  0x50   :  { %233 = vpow2.f32 %v138_v61 }
  0x5a   :  { %v228_v10 = vpop.eup %227 }
  0x5b   :  { %v230_v12 = vpop.eup %229  ;;  %v140_v14 = vmul.f32 %v228_v10, %v228_v10  ;;  %v144_v15 = vsub.f32 1.0, %v228_v10 }
  0x5c   :  { %v141_v18 = vmul.f32 %v230_v12, %v230_v12  ;;  %v145_v19 = vsub.f32 1.0, %v230_v12  ;;  %v232_v21 = vpop.eup %231 }
  0x5d   :  { %v148_v22 = vmul.f32 %v144_v15, %v144_v15  ;;  %v164_v23 = vmul.f32 %v160_v7, %v140_v14  ;;  %v142_v28 = vmul.f32 %v232_v21, %v232_v21  ;;  %v146_v29 = vsub.f32 1.0, %v232_v21  ;;  %v234_v33 = vpop.eup %233 }
  0x5e   :  { %v149_v26 = vmul.f32 %v145_v19, %v145_v19  ;;  %v165_v27 = vmul.f32 %v161_v11, %v141_v18  ;;  %v143_v41 = vmul.f32 %v234_v33, %v234_v33  ;;  %v147_v42 = vsub.f32 1.0, %v234_v33 }
  0x5f   :  { %v152_v30 = vmul.f32 %v148_v22, %v72_v2  ;;  %v168_v31 = vmul.f32 %v164_v23, %v128_v13  ;;  %v150_v36 = vmul.f32 %v146_v29, %v146_v29  ;;  %v166_v37 = vmul.f32 %v162_v16, %v142_v28 }
  0x60   :  { %v153_v34 = vmul.f32 %v149_v26, %v73_v4  ;;  %v169_v35 = vmul.f32 %v165_v27, %v129_v17  ;;  %v151_v46 = vmul.f32 %v147_v42, %v147_v42  ;;  %v167_v47 = vmul.f32 %v163_v32, %v143_v41 }
  0x61   :  { %v156_v39 = vmul.f32 %v152_v30, %v124_v51  ;;  %v154_v44 = vmul.f32 %v150_v36, %v74_v6  ;;  %v170_v45 = vmul.f32 %v166_v37, %v130_v24 }
  0x62   :  { %v157_v43 = vmul.f32 %v153_v34, %v125_v52  ;;  %v155_v53 = vmul.f32 %v151_v46, %v75_v20  ;;  %v171_v54 = vmul.f32 %v167_v47, %v131_v40 }
  0x63   :  { %v172_v38 = vadd.f32 %v168_v31, %v156_v39  ;;  %v158_v49 = vmul.f32 %v154_v44, %v126_v57 }
  0x64   :  { %v173_v48 = vadd.f32 %v169_v35, %v157_v43  ;;  %v159_v51 = vmul.f32 %v155_v53, %v127_v60 }
  0x65   :  { %v176_v50 = vsub.f32 0.0, %v172_v38  ;;  %v174_v56 = vadd.f32 %v170_v45, %v158_v49 }
  0x66   :  { %v177_v55 = vsub.f32 0.0, %v173_v48  ;;  %v175_v61 = vadd.f32 %v171_v54, %v159_v51 }
  0x67   :  { %v180_v58 = vsel %vm54_vm0, %v176_v50, 0.0  ;;  %v178_v59 = vsub.f32 0.0, %v174_v56 }
  0x68   :  { %188 = vst [vmem:[#allocation7] sm:$0xff] %v180_v58  ;;  %v181_v52 = vsel %vm54_vm0, %v177_v55, 0.0  ;;  %v179_v62 = vsub.f32 0.0, %v175_v61 }
  0x69   :  { %189 = vst [vmem:[#allocation7 + $0x8] sm:$0xff] %v181_v52  ;;  %v182_v57 = vsel %vm54_vm0, %v178_v59, 0.0 }
  0x6a   :  { %190 = vst [vmem:[#allocation7 + $0x10] sm:$0xff] %v182_v57  ;;  %v183_v63 = vsel %vm54_vm0, %v179_v62, 0.0 }
  0x6b   :  { %191 = vst [vmem:[#allocation7 + $0x18] sm:$0xff] %v183_v63 }
  0x6c   :  { %286 = shalt.err (!%p283_p0)
}
  0x6d   :  { %201 = dma.vmem_to_hbm [thread:$0]  %s199_s1, 512, %s373_s2, [#allocation4]  }
  0x6e   :  { %299 = dma.done.wait [#allocation4], 512  }
  0x6f   :  { %300 = vsyncadd [#allocation4], 4294966784 }
  0x70   :  { %205 = vsyncpa [#allocation3], 1 }
  0x71   :  { %206 = vsyncpa [#allocation6], 1 }
  0x72   :  { %207 = vsyncpa [#allocation4], 1 }

</bundles_post_ra>
